<compile_context>
chip_gen: v6e
topology: v6e:2x2x1
jax: 0.10.0
libtpu: 0.0.40
codegen_flags: <defaults>
</compile_context>

<pallas_src>
import math

import jax
import jax.numpy as jnp
from jax.experimental import pallas as pl
from jax.experimental.pallas import tpu as pltpu

_INV_SQRT2 = 1.0 / math.sqrt(2.0)
_BN_EPS = 1e-5


def channel_mixing_kernel(x_ref, w_ref, b_ref, gamma_ref, beta_ref, o_ref):
    # x_ref  : (N, C, HW) f32 in VMEM   (HW on the lane axis -> dense)
    # w_ref  : (C*C,)     f32 in SMEM   (conv weight, row-major: w[co*C + ci])
    # b_ref  : (C,)       f32 in SMEM   (conv bias)
    # gamma_ref / beta_ref : (C,) f32 in SMEM  (BN affine params)
    # o_ref  : (N, C, HW) f32 in VMEM
    n, c, hw = x_ref.shape
    inv_count = 1.0 / float(n * hw)           # BN averages over N*H*W

    x = x_ref[...]                            # (N, C, HW)

    for co in range(c):                       # C = 4: fully unrolled
        # ---- 1x1 conv as unrolled lane-dense VPU MACs (no MXU) ----
        acc = x[:, 0, :] * w_ref[co * c + 0]
        for ci in range(1, c):
            acc = acc + x[:, ci, :] * w_ref[co * c + ci]
        acc = acc + b_ref[co]                 # (N, HW)

        # ---- exact GELU (PyTorch nn.GELU default, approximate='none') ----
        g = 0.5 * acc * (1.0 + jax.lax.erf(acc * _INV_SQRT2))

        # ---- BatchNorm2d (training): fused per-channel sum / sum-of-squares ----
        mean = jnp.sum(g) * inv_count
        mean_sq = jnp.sum(g * g) * inv_count
        var = mean_sq - mean * mean           # biased variance over N*H*W
        scale = jax.lax.rsqrt(var + _BN_EPS) * gamma_ref[co]
        shift = beta_ref[co] - mean * scale

        out_c = (g * scale + shift).astype(o_ref.dtype)     # (N, HW)
        o_ref[:, co:co + 1, :] = out_c[:, None, :]


@jax.jit
def channel_aware_mixing(x_nchw, conv_w, conv_b, gamma, beta):
    """Forward of ChannelAwareMixing (training-mode BN).

    x_nchw : (N, C, H, W) float32
    conv_w : (C_out, C_in) == torch conv.weight[:, :, 0, 0]
    conv_b, gamma, beta : (C,)
    """
    N, C, H, W = x_nchw.shape
    HW = H * W
    x3d = x_nchw.reshape(N, C, HW)            # pure view, no transpose

    out3d = pl.pallas_call(
        channel_mixing_kernel,
        out_shape=jax.ShapeDtypeStruct((N, C, HW), x_nchw.dtype),
        in_specs=[
            pl.BlockSpec(memory_space=pltpu.MemorySpace.VMEM),   # x slab
            pl.BlockSpec(memory_space=pltpu.MemorySpace.SMEM),   # conv weight
            pl.BlockSpec(memory_space=pltpu.MemorySpace.SMEM),   # conv bias
            pl.BlockSpec(memory_space=pltpu.MemorySpace.SMEM),   # BN gamma
            pl.BlockSpec(memory_space=pltpu.MemorySpace.SMEM),   # BN beta
        ],
        out_specs=pl.BlockSpec(memory_space=pltpu.MemorySpace.VMEM),
    )(x3d, conv_w.reshape(-1), conv_b, gamma, beta)

    return out3d.reshape(N, C, H, W)


def reference(x_nchw, conv_w, conv_b, gamma, beta):
    """Pure-JAX reference mirroring the PyTorch forward (training-mode BN)."""
    y = jnp.einsum("oc,nchw->nohw", conv_w, x_nchw) + conv_b[None, :, None, None]
    y = 0.5 * y * (1.0 + jax.lax.erf(y / jnp.sqrt(2.0)))
    mean = y.mean(axis=(0, 2, 3), keepdims=True)
    var = jnp.square(y - mean).mean(axis=(0, 2, 3), keepdims=True)
    return ((y - mean) * jax.lax.rsqrt(var + _BN_EPS) * gamma[None, :, None, None]
            + beta[None, :, None, None])


if __name__ == "__main__":
    N, C, H, W = 2, 4, 16, 16

    key = jax.random.PRNGKey(0)
    kx, kw, kb, kg, kbeta = jax.random.split(key, 5)

    x = jax.random.normal(kx, (N, C, H, W), dtype=jnp.float32)

    # Deterministic synthetic parameters (Conv2d 1x1: weight (Cout, Cin),
    # bias (Cout,); BatchNorm2d: gamma (C,), beta (C,)).
    bound = 1.0 / math.sqrt(C)  # kaiming-uniform-like scale for a 1x1 conv
    conv_w = jax.random.uniform(kw, (C, C), jnp.float32, -bound, bound)  # (Cout, Cin)
    conv_b = jax.random.uniform(kb, (C,), jnp.float32, -bound, bound)
    gamma = 1.0 + 0.1 * jax.random.normal(kg, (C,), dtype=jnp.float32)
    beta = 0.1 * jax.random.normal(kbeta, (C,), dtype=jnp.float32)

    out = jax.block_until_ready(channel_aware_mixing(x, conv_w, conv_b, gamma, beta))
    ref = jax.block_until_ready(reference(x, conv_w, conv_b, gamma, beta))

    assert out.shape == (N, C, H, W)
    assert jnp.allclose(out, ref, atol=5e-5, rtol=1e-4), "mismatch vs reference"

    print("KERNEL_OK")
</pallas_src>

<mosaic_0001>
module attributes {stable_mosaic.version = 11 : i64} {
  func.func @channel_mixing_kernel(%arg0: memref<2x4x256xf32, #tpu.memory_space<vmem>>, %arg1: memref<16xf32, #tpu.memory_space<smem>>, %arg2: memref<4xf32, #tpu.memory_space<smem>>, %arg3: memref<4xf32, #tpu.memory_space<smem>>, %arg4: memref<4xf32, #tpu.memory_space<smem>>, %arg5: memref<2x4x256xf32, #tpu.memory_space<vmem>>) attributes {dimension_semantics = [], scalar_prefetch = 0 : i64, scratch_operands = 0 : i64, tpu.core_type = #tpu.core_type<tc>} {
    %c0 = arith.constant 0 : index
    %c0_0 = arith.constant 0 : index
    %c0_1 = arith.constant 0 : index
    %0 = vector.load %arg0[%c0, %c0_0, %c0_1] : memref<2x4x256xf32, #tpu.memory_space<vmem>>, vector<2x4x256xf32>
    %1 = vector.extract_strided_slice %0 {offsets = [0, 0, 0], sizes = [2, 1, 256], strides = [1, 1, 1]} : vector<2x4x256xf32> to vector<2x1x256xf32>
    %2 = vector.shape_cast %1 : vector<2x1x256xf32> to vector<2x256xf32>
    %c0_2 = arith.constant 0 : index
    %3 = memref.load %arg1[%c0_2] : memref<16xf32, #tpu.memory_space<smem>>
    %4 = vector.broadcast %3 : f32 to vector<2x256xf32>
    %5 = arith.mulf %2, %4 : vector<2x256xf32>
    %6 = vector.extract_strided_slice %0 {offsets = [0, 1, 0], sizes = [2, 1, 256], strides = [1, 1, 1]} : vector<2x4x256xf32> to vector<2x1x256xf32>
    %7 = vector.shape_cast %6 : vector<2x1x256xf32> to vector<2x256xf32>
    %c1 = arith.constant 1 : index
    %8 = memref.load %arg1[%c1] : memref<16xf32, #tpu.memory_space<smem>>
    %9 = vector.broadcast %8 : f32 to vector<2x256xf32>
    %10 = arith.mulf %7, %9 : vector<2x256xf32>
    %11 = arith.addf %5, %10 : vector<2x256xf32>
    %12 = vector.extract_strided_slice %0 {offsets = [0, 2, 0], sizes = [2, 1, 256], strides = [1, 1, 1]} : vector<2x4x256xf32> to vector<2x1x256xf32>
    %13 = vector.shape_cast %12 : vector<2x1x256xf32> to vector<2x256xf32>
    %c2 = arith.constant 2 : index
    %14 = memref.load %arg1[%c2] : memref<16xf32, #tpu.memory_space<smem>>
    %15 = vector.broadcast %14 : f32 to vector<2x256xf32>
    %16 = arith.mulf %13, %15 : vector<2x256xf32>
    %17 = arith.addf %11, %16 : vector<2x256xf32>
    %18 = vector.extract_strided_slice %0 {offsets = [0, 3, 0], sizes = [2, 1, 256], strides = [1, 1, 1]} : vector<2x4x256xf32> to vector<2x1x256xf32>
    %19 = vector.shape_cast %18 : vector<2x1x256xf32> to vector<2x256xf32>
    %c3 = arith.constant 3 : index
    %20 = memref.load %arg1[%c3] : memref<16xf32, #tpu.memory_space<smem>>
    %21 = vector.broadcast %20 : f32 to vector<2x256xf32>
    %22 = arith.mulf %19, %21 : vector<2x256xf32>
    %23 = arith.addf %17, %22 : vector<2x256xf32>
    %c0_3 = arith.constant 0 : index
    %24 = memref.load %arg2[%c0_3] : memref<4xf32, #tpu.memory_space<smem>>
    %25 = vector.broadcast %24 : f32 to vector<2x256xf32>
    %26 = arith.addf %23, %25 : vector<2x256xf32>
    %cst = arith.constant 5.000000e-01 : f32
    %27 = vector.broadcast %cst : f32 to vector<2x256xf32>
    %28 = arith.mulf %27, %26 : vector<2x256xf32>
    %cst_4 = arith.constant 0.707106769 : f32
    %29 = vector.broadcast %cst_4 : f32 to vector<2x256xf32>
    %30 = arith.mulf %26, %29 : vector<2x256xf32>
    %31 = math.erf %30 : vector<2x256xf32>
    %cst_5 = arith.constant 1.000000e+00 : f32
    %32 = vector.broadcast %cst_5 : f32 to vector<2x256xf32>
    %33 = arith.addf %32, %31 : vector<2x256xf32>
    %34 = arith.mulf %28, %33 : vector<2x256xf32>
    %35 = vector.shape_cast %34 : vector<2x256xf32> to vector<1x2x256xf32>
    %cst_6 = arith.constant dense<0.000000e+00> : vector<1xf32>
    %36 = vector.multi_reduction <add>, %35, %cst_6 [1, 2] : vector<1x2x256xf32> to vector<1xf32>
    %37 = vector.shape_cast %36 : vector<1xf32> to vector<1x1x1xf32>
    %38 = vector.extract %37[0, 0, 0] : f32 from vector<1x1x1xf32>
    %cst_7 = arith.constant 0.001953125 : f32
    %39 = arith.mulf %38, %cst_7 : f32
    %40 = arith.mulf %34, %34 : vector<2x256xf32>
    %41 = vector.shape_cast %40 : vector<2x256xf32> to vector<1x2x256xf32>
    %cst_8 = arith.constant dense<0.000000e+00> : vector<1xf32>
    %42 = vector.multi_reduction <add>, %41, %cst_8 [1, 2] : vector<1x2x256xf32> to vector<1xf32>
    %43 = vector.shape_cast %42 : vector<1xf32> to vector<1x1x1xf32>
    %44 = vector.extract %43[0, 0, 0] : f32 from vector<1x1x1xf32>
    %cst_9 = arith.constant 0.001953125 : f32
    %45 = arith.mulf %44, %cst_9 : f32
    %46 = arith.mulf %39, %39 : f32
    %47 = arith.subf %45, %46 : f32
    %cst_10 = arith.constant 9.99999974E-6 : f32
    %48 = arith.addf %47, %cst_10 : f32
    %49 = math.rsqrt %48 : f32
    %c0_11 = arith.constant 0 : index
    %50 = memref.load %arg3[%c0_11] : memref<4xf32, #tpu.memory_space<smem>>
    %51 = arith.mulf %49, %50 : f32
    %c0_12 = arith.constant 0 : index
    %52 = memref.load %arg4[%c0_12] : memref<4xf32, #tpu.memory_space<smem>>
    %53 = arith.mulf %39, %51 : f32
    %54 = arith.subf %52, %53 : f32
    %55 = vector.broadcast %51 : f32 to vector<2x256xf32>
    %56 = arith.mulf %34, %55 : vector<2x256xf32>
    %57 = vector.broadcast %54 : f32 to vector<2x256xf32>
    %58 = arith.addf %56, %57 : vector<2x256xf32>
    %59 = vector.shape_cast %58 : vector<2x256xf32> to vector<2x1x256xf32>
    %c0_13 = arith.constant 0 : index
    %c0_14 = arith.constant 0 : index
    %c0_15 = arith.constant 0 : index
    %60 = vector.load %arg5[%c0_13, %c0_14, %c0_15] : memref<2x4x256xf32, #tpu.memory_space<vmem>>, vector<2x1x256xf32>
    tpu.vector_store %arg5[%c0_13, %c0_14, %c0_15], %59 {strides = array<i32>} : memref<2x4x256xf32, #tpu.memory_space<vmem>>, vector<2x1x256xf32>,
    %61 = vector.extract_strided_slice %0 {offsets = [0, 0, 0], sizes = [2, 1, 256], strides = [1, 1, 1]} : vector<2x4x256xf32> to vector<2x1x256xf32>
    %62 = vector.shape_cast %61 : vector<2x1x256xf32> to vector<2x256xf32>
    %c4 = arith.constant 4 : index
    %63 = memref.load %arg1[%c4] : memref<16xf32, #tpu.memory_space<smem>>
    %64 = vector.broadcast %63 : f32 to vector<2x256xf32>
    %65 = arith.mulf %62, %64 : vector<2x256xf32>
    %66 = vector.extract_strided_slice %0 {offsets = [0, 1, 0], sizes = [2, 1, 256], strides = [1, 1, 1]} : vector<2x4x256xf32> to vector<2x1x256xf32>
    %67 = vector.shape_cast %66 : vector<2x1x256xf32> to vector<2x256xf32>
    %c5 = arith.constant 5 : index
    %68 = memref.load %arg1[%c5] : memref<16xf32, #tpu.memory_space<smem>>
    %69 = vector.broadcast %68 : f32 to vector<2x256xf32>
    %70 = arith.mulf %67, %69 : vector<2x256xf32>
    %71 = arith.addf %65, %70 : vector<2x256xf32>
    %72 = vector.extract_strided_slice %0 {offsets = [0, 2, 0], sizes = [2, 1, 256], strides = [1, 1, 1]} : vector<2x4x256xf32> to vector<2x1x256xf32>
    %73 = vector.shape_cast %72 : vector<2x1x256xf32> to vector<2x256xf32>
    %c6 = arith.constant 6 : index
    %74 = memref.load %arg1[%c6] : memref<16xf32, #tpu.memory_space<smem>>
    %75 = vector.broadcast %74 : f32 to vector<2x256xf32>
    %76 = arith.mulf %73, %75 : vector<2x256xf32>
    %77 = arith.addf %71, %76 : vector<2x256xf32>
    %78 = vector.extract_strided_slice %0 {offsets = [0, 3, 0], sizes = [2, 1, 256], strides = [1, 1, 1]} : vector<2x4x256xf32> to vector<2x1x256xf32>
    %79 = vector.shape_cast %78 : vector<2x1x256xf32> to vector<2x256xf32>
    %c7 = arith.constant 7 : index
    %80 = memref.load %arg1[%c7] : memref<16xf32, #tpu.memory_space<smem>>
    %81 = vector.broadcast %80 : f32 to vector<2x256xf32>
    %82 = arith.mulf %79, %81 : vector<2x256xf32>
    %83 = arith.addf %77, %82 : vector<2x256xf32>
    %c1_16 = arith.constant 1 : index
    %84 = memref.load %arg2[%c1_16] : memref<4xf32, #tpu.memory_space<smem>>
    %85 = vector.broadcast %84 : f32 to vector<2x256xf32>
    %86 = arith.addf %83, %85 : vector<2x256xf32>
    %cst_17 = arith.constant 5.000000e-01 : f32
    %87 = vector.broadcast %cst_17 : f32 to vector<2x256xf32>
    %88 = arith.mulf %87, %86 : vector<2x256xf32>
    %cst_18 = arith.constant 0.707106769 : f32
    %89 = vector.broadcast %cst_18 : f32 to vector<2x256xf32>
    %90 = arith.mulf %86, %89 : vector<2x256xf32>
    %91 = math.erf %90 : vector<2x256xf32>
    %cst_19 = arith.constant 1.000000e+00 : f32
    %92 = vector.broadcast %cst_19 : f32 to vector<2x256xf32>
    %93 = arith.addf %92, %91 : vector<2x256xf32>
    %94 = arith.mulf %88, %93 : vector<2x256xf32>
    %95 = vector.shape_cast %94 : vector<2x256xf32> to vector<1x2x256xf32>
    %cst_20 = arith.constant dense<0.000000e+00> : vector<1xf32>
    %96 = vector.multi_reduction <add>, %95, %cst_20 [1, 2] : vector<1x2x256xf32> to vector<1xf32>
    %97 = vector.shape_cast %96 : vector<1xf32> to vector<1x1x1xf32>
    %98 = vector.extract %97[0, 0, 0] : f32 from vector<1x1x1xf32>
    %cst_21 = arith.constant 0.001953125 : f32
    %99 = arith.mulf %98, %cst_21 : f32
    %100 = arith.mulf %94, %94 : vector<2x256xf32>
    %101 = vector.shape_cast %100 : vector<2x256xf32> to vector<1x2x256xf32>
    %cst_22 = arith.constant dense<0.000000e+00> : vector<1xf32>
    %102 = vector.multi_reduction <add>, %101, %cst_22 [1, 2] : vector<1x2x256xf32> to vector<1xf32>
    %103 = vector.shape_cast %102 : vector<1xf32> to vector<1x1x1xf32>
    %104 = vector.extract %103[0, 0, 0] : f32 from vector<1x1x1xf32>
    %cst_23 = arith.constant 0.001953125 : f32
    %105 = arith.mulf %104, %cst_23 : f32
    %106 = arith.mulf %99, %99 : f32
    %107 = arith.subf %105, %106 : f32
    %cst_24 = arith.constant 9.99999974E-6 : f32
    %108 = arith.addf %107, %cst_24 : f32
    %109 = math.rsqrt %108 : f32
    %c1_25 = arith.constant 1 : index
    %110 = memref.load %arg3[%c1_25] : memref<4xf32, #tpu.memory_space<smem>>
    %111 = arith.mulf %109, %110 : f32
    %c1_26 = arith.constant 1 : index
    %112 = memref.load %arg4[%c1_26] : memref<4xf32, #tpu.memory_space<smem>>
    %113 = arith.mulf %99, %111 : f32
    %114 = arith.subf %112, %113 : f32
    %115 = vector.broadcast %111 : f32 to vector<2x256xf32>
    %116 = arith.mulf %94, %115 : vector<2x256xf32>
    %117 = vector.broadcast %114 : f32 to vector<2x256xf32>
    %118 = arith.addf %116, %117 : vector<2x256xf32>
    %119 = vector.shape_cast %118 : vector<2x256xf32> to vector<2x1x256xf32>
    %c0_27 = arith.constant 0 : index
    %c1_28 = arith.constant 1 : index
    %c0_29 = arith.constant 0 : index
    %120 = vector.load %arg5[%c0_27, %c1_28, %c0_29] : memref<2x4x256xf32, #tpu.memory_space<vmem>>, vector<2x1x256xf32>
    tpu.vector_store %arg5[%c0_27, %c1_28, %c0_29], %119 {strides = array<i32>} : memref<2x4x256xf32, #tpu.memory_space<vmem>>, vector<2x1x256xf32>,
    %121 = vector.extract_strided_slice %0 {offsets = [0, 0, 0], sizes = [2, 1, 256], strides = [1, 1, 1]} : vector<2x4x256xf32> to vector<2x1x256xf32>
    %122 = vector.shape_cast %121 : vector<2x1x256xf32> to vector<2x256xf32>
    %c8 = arith.constant 8 : index
    %123 = memref.load %arg1[%c8] : memref<16xf32, #tpu.memory_space<smem>>
    %124 = vector.broadcast %123 : f32 to vector<2x256xf32>
    %125 = arith.mulf %122, %124 : vector<2x256xf32>
    %126 = vector.extract_strided_slice %0 {offsets = [0, 1, 0], sizes = [2, 1, 256], strides = [1, 1, 1]} : vector<2x4x256xf32> to vector<2x1x256xf32>
    %127 = vector.shape_cast %126 : vector<2x1x256xf32> to vector<2x256xf32>
    %c9 = arith.constant 9 : index
    %128 = memref.load %arg1[%c9] : memref<16xf32, #tpu.memory_space<smem>>
    %129 = vector.broadcast %128 : f32 to vector<2x256xf32>
    %130 = arith.mulf %127, %129 : vector<2x256xf32>
    %131 = arith.addf %125, %130 : vector<2x256xf32>
    %132 = vector.extract_strided_slice %0 {offsets = [0, 2, 0], sizes = [2, 1, 256], strides = [1, 1, 1]} : vector<2x4x256xf32> to vector<2x1x256xf32>
    %133 = vector.shape_cast %132 : vector<2x1x256xf32> to vector<2x256xf32>
    %c10 = arith.constant 10 : index
    %134 = memref.load %arg1[%c10] : memref<16xf32, #tpu.memory_space<smem>>
    %135 = vector.broadcast %134 : f32 to vector<2x256xf32>
    %136 = arith.mulf %133, %135 : vector<2x256xf32>
    %137 = arith.addf %131, %136 : vector<2x256xf32>
    %138 = vector.extract_strided_slice %0 {offsets = [0, 3, 0], sizes = [2, 1, 256], strides = [1, 1, 1]} : vector<2x4x256xf32> to vector<2x1x256xf32>
    %139 = vector.shape_cast %138 : vector<2x1x256xf32> to vector<2x256xf32>
    %c11 = arith.constant 11 : index
    %140 = memref.load %arg1[%c11] : memref<16xf32, #tpu.memory_space<smem>>
    %141 = vector.broadcast %140 : f32 to vector<2x256xf32>
    %142 = arith.mulf %139, %141 : vector<2x256xf32>
    %143 = arith.addf %137, %142 : vector<2x256xf32>
    %c2_30 = arith.constant 2 : index
    %144 = memref.load %arg2[%c2_30] : memref<4xf32, #tpu.memory_space<smem>>
    %145 = vector.broadcast %144 : f32 to vector<2x256xf32>
    %146 = arith.addf %143, %145 : vector<2x256xf32>
    %cst_31 = arith.constant 5.000000e-01 : f32
    %147 = vector.broadcast %cst_31 : f32 to vector<2x256xf32>
    %148 = arith.mulf %147, %146 : vector<2x256xf32>
    %cst_32 = arith.constant 0.707106769 : f32
    %149 = vector.broadcast %cst_32 : f32 to vector<2x256xf32>
    %150 = arith.mulf %146, %149 : vector<2x256xf32>
    %151 = math.erf %150 : vector<2x256xf32>
    %cst_33 = arith.constant 1.000000e+00 : f32
    %152 = vector.broadcast %cst_33 : f32 to vector<2x256xf32>
    %153 = arith.addf %152, %151 : vector<2x256xf32>
    %154 = arith.mulf %148, %153 : vector<2x256xf32>
    %155 = vector.shape_cast %154 : vector<2x256xf32> to vector<1x2x256xf32>
    %cst_34 = arith.constant dense<0.000000e+00> : vector<1xf32>
    %156 = vector.multi_reduction <add>, %155, %cst_34 [1, 2] : vector<1x2x256xf32> to vector<1xf32>
    %157 = vector.shape_cast %156 : vector<1xf32> to vector<1x1x1xf32>
    %158 = vector.extract %157[0, 0, 0] : f32 from vector<1x1x1xf32>
    %cst_35 = arith.constant 0.001953125 : f32
    %159 = arith.mulf %158, %cst_35 : f32
    %160 = arith.mulf %154, %154 : vector<2x256xf32>
    %161 = vector.shape_cast %160 : vector<2x256xf32> to vector<1x2x256xf32>
    %cst_36 = arith.constant dense<0.000000e+00> : vector<1xf32>
    %162 = vector.multi_reduction <add>, %161, %cst_36 [1, 2] : vector<1x2x256xf32> to vector<1xf32>
    %163 = vector.shape_cast %162 : vector<1xf32> to vector<1x1x1xf32>
    %164 = vector.extract %163[0, 0, 0] : f32 from vector<1x1x1xf32>
    %cst_37 = arith.constant 0.001953125 : f32
    %165 = arith.mulf %164, %cst_37 : f32
    %166 = arith.mulf %159, %159 : f32
    %167 = arith.subf %165, %166 : f32
    %cst_38 = arith.constant 9.99999974E-6 : f32
    %168 = arith.addf %167, %cst_38 : f32
    %169 = math.rsqrt %168 : f32
    %c2_39 = arith.constant 2 : index
    %170 = memref.load %arg3[%c2_39] : memref<4xf32, #tpu.memory_space<smem>>
    %171 = arith.mulf %169, %170 : f32
    %c2_40 = arith.constant 2 : index
    %172 = memref.load %arg4[%c2_40] : memref<4xf32, #tpu.memory_space<smem>>
    %173 = arith.mulf %159, %171 : f32
    %174 = arith.subf %172, %173 : f32
    %175 = vector.broadcast %171 : f32 to vector<2x256xf32>
    %176 = arith.mulf %154, %175 : vector<2x256xf32>
    %177 = vector.broadcast %174 : f32 to vector<2x256xf32>
    %178 = arith.addf %176, %177 : vector<2x256xf32>
    %179 = vector.shape_cast %178 : vector<2x256xf32> to vector<2x1x256xf32>
    %c0_41 = arith.constant 0 : index
    %c2_42 = arith.constant 2 : index
    %c0_43 = arith.constant 0 : index
    %180 = vector.load %arg5[%c0_41, %c2_42, %c0_43] : memref<2x4x256xf32, #tpu.memory_space<vmem>>, vector<2x1x256xf32>
    tpu.vector_store %arg5[%c0_41, %c2_42, %c0_43], %179 {strides = array<i32>} : memref<2x4x256xf32, #tpu.memory_space<vmem>>, vector<2x1x256xf32>,
    %181 = vector.extract_strided_slice %0 {offsets = [0, 0, 0], sizes = [2, 1, 256], strides = [1, 1, 1]} : vector<2x4x256xf32> to vector<2x1x256xf32>
    %182 = vector.shape_cast %181 : vector<2x1x256xf32> to vector<2x256xf32>
    %c12 = arith.constant 12 : index
    %183 = memref.load %arg1[%c12] : memref<16xf32, #tpu.memory_space<smem>>
    %184 = vector.broadcast %183 : f32 to vector<2x256xf32>
    %185 = arith.mulf %182, %184 : vector<2x256xf32>
    %186 = vector.extract_strided_slice %0 {offsets = [0, 1, 0], sizes = [2, 1, 256], strides = [1, 1, 1]} : vector<2x4x256xf32> to vector<2x1x256xf32>
    %187 = vector.shape_cast %186 : vector<2x1x256xf32> to vector<2x256xf32>
    %c13 = arith.constant 13 : index
    %188 = memref.load %arg1[%c13] : memref<16xf32, #tpu.memory_space<smem>>
    %189 = vector.broadcast %188 : f32 to vector<2x256xf32>
    %190 = arith.mulf %187, %189 : vector<2x256xf32>
    %191 = arith.addf %185, %190 : vector<2x256xf32>
    %192 = vector.extract_strided_slice %0 {offsets = [0, 2, 0], sizes = [2, 1, 256], strides = [1, 1, 1]} : vector<2x4x256xf32> to vector<2x1x256xf32>
    %193 = vector.shape_cast %192 : vector<2x1x256xf32> to vector<2x256xf32>
    %c14 = arith.constant 14 : index
    %194 = memref.load %arg1[%c14] : memref<16xf32, #tpu.memory_space<smem>>
    %195 = vector.broadcast %194 : f32 to vector<2x256xf32>
    %196 = arith.mulf %193, %195 : vector<2x256xf32>
    %197 = arith.addf %191, %196 : vector<2x256xf32>
    %198 = vector.extract_strided_slice %0 {offsets = [0, 3, 0], sizes = [2, 1, 256], strides = [1, 1, 1]} : vector<2x4x256xf32> to vector<2x1x256xf32>
    %199 = vector.shape_cast %198 : vector<2x1x256xf32> to vector<2x256xf32>
    %c15 = arith.constant 15 : index
    %200 = memref.load %arg1[%c15] : memref<16xf32, #tpu.memory_space<smem>>
    %201 = vector.broadcast %200 : f32 to vector<2x256xf32>
    %202 = arith.mulf %199, %201 : vector<2x256xf32>
    %203 = arith.addf %197, %202 : vector<2x256xf32>
    %c3_44 = arith.constant 3 : index
    %204 = memref.load %arg2[%c3_44] : memref<4xf32, #tpu.memory_space<smem>>
    %205 = vector.broadcast %204 : f32 to vector<2x256xf32>
    %206 = arith.addf %203, %205 : vector<2x256xf32>
    %cst_45 = arith.constant 5.000000e-01 : f32
    %207 = vector.broadcast %cst_45 : f32 to vector<2x256xf32>
    %208 = arith.mulf %207, %206 : vector<2x256xf32>
    %cst_46 = arith.constant 0.707106769 : f32
    %209 = vector.broadcast %cst_46 : f32 to vector<2x256xf32>
    %210 = arith.mulf %206, %209 : vector<2x256xf32>
    %211 = math.erf %210 : vector<2x256xf32>
    %cst_47 = arith.constant 1.000000e+00 : f32
    %212 = vector.broadcast %cst_47 : f32 to vector<2x256xf32>
    %213 = arith.addf %212, %211 : vector<2x256xf32>
    %214 = arith.mulf %208, %213 : vector<2x256xf32>
    %215 = vector.shape_cast %214 : vector<2x256xf32> to vector<1x2x256xf32>
    %cst_48 = arith.constant dense<0.000000e+00> : vector<1xf32>
    %216 = vector.multi_reduction <add>, %215, %cst_48 [1, 2] : vector<1x2x256xf32> to vector<1xf32>
    %217 = vector.shape_cast %216 : vector<1xf32> to vector<1x1x1xf32>
    %218 = vector.extract %217[0, 0, 0] : f32 from vector<1x1x1xf32>
    %cst_49 = arith.constant 0.001953125 : f32
    %219 = arith.mulf %218, %cst_49 : f32
    %220 = arith.mulf %214, %214 : vector<2x256xf32>
    %221 = vector.shape_cast %220 : vector<2x256xf32> to vector<1x2x256xf32>
    %cst_50 = arith.constant dense<0.000000e+00> : vector<1xf32>
    %222 = vector.multi_reduction <add>, %221, %cst_50 [1, 2] : vector<1x2x256xf32> to vector<1xf32>
    %223 = vector.shape_cast %222 : vector<1xf32> to vector<1x1x1xf32>
    %224 = vector.extract %223[0, 0, 0] : f32 from vector<1x1x1xf32>
    %cst_51 = arith.constant 0.001953125 : f32
    %225 = arith.mulf %224, %cst_51 : f32
    %226 = arith.mulf %219, %219 : f32
    %227 = arith.subf %225, %226 : f32
    %cst_52 = arith.constant 9.99999974E-6 : f32
    %228 = arith.addf %227, %cst_52 : f32
    %229 = math.rsqrt %228 : f32
    %c3_53 = arith.constant 3 : index
    %230 = memref.load %arg3[%c3_53] : memref<4xf32, #tpu.memory_space<smem>>
    %231 = arith.mulf %229, %230 : f32
    %c3_54 = arith.constant 3 : index
    %232 = memref.load %arg4[%c3_54] : memref<4xf32, #tpu.memory_space<smem>>
    %233 = arith.mulf %219, %231 : f32
    %234 = arith.subf %232, %233 : f32
    %235 = vector.broadcast %231 : f32 to vector<2x256xf32>
    %236 = arith.mulf %214, %235 : vector<2x256xf32>
    %237 = vector.broadcast %234 : f32 to vector<2x256xf32>
    %238 = arith.addf %236, %237 : vector<2x256xf32>
    %239 = vector.shape_cast %238 : vector<2x256xf32> to vector<2x1x256xf32>
    %c0_55 = arith.constant 0 : index
    %c3_56 = arith.constant 3 : index
    %c0_57 = arith.constant 0 : index
    %240 = vector.load %arg5[%c0_55, %c3_56, %c0_57] : memref<2x4x256xf32, #tpu.memory_space<vmem>>, vector<2x1x256xf32>
    tpu.vector_store %arg5[%c0_55, %c3_56, %c0_57], %239 {strides = array<i32>} : memref<2x4x256xf32, #tpu.memory_space<vmem>>, vector<2x1x256xf32>,
    return
  }
}

</mosaic_0001>

<bundles_post_ra>
// kernel: channel_aware_mixing.1
= control target key start
LH: loop header
LB: loop body
LE: loop exit
PB: predicated region body
PF: predicated region fallthrough
CT: control target
= control target key end

     0   :  { %10 = vsyncpa [#allocation3], 0  ;;  %s1304_s0 = inlined_call_operand.vmem [shape: f32[2,4,256], index: 0, kind: input, shape index: {}]   ;;  %s1305_s1 = inlined_call_operand.vmem [shape: f32[16], index: 1, kind: input, shape index: {}]   ;;  %s1306_s2 = inlined_call_operand.vmem [shape: f32[4], index: 2, kind: input, shape index: {}]   ;;  %s1307_s3 = inlined_call_operand.vmem [shape: f32[4], index: 3, kind: input, shape index: {}]   ;;  %s1308_s4 = inlined_call_operand.vmem [shape: f32[4], index: 4, kind: input, shape index: {}]   ;;  %s1309_s5 = inlined_call_operand.vmem [shape: f32[2,4,256], index: 5, kind: output, shape index: {}]  }
   0x1   :  { %11 = vsyncpa [#allocation5], 0  ;;  %s31_s20 = sshll.u32 %s1306_s2, 4  ;;  %s32_s20 = int_to_ptr.vmem [resolvable:$true] %s31_s20 }
   0x2   :  { %12 = vsyncpa [#allocation8], 0  ;;  %s21_s23 = sshll.u32 %s1305_s1, 4  ;;  %s930_s24 = scalar_lea.vmem %s32_s20, 16  ;;  %s22_s23 = int_to_ptr.vmem [resolvable:$true] %s21_s23 }
   0x3   :  { %p931_p0 = scmp.ne.s32.totalorder %s32_s20, %s930_s24  ;;  %p935_p1 = scmp.lt.s32.totalorder %s32_s20, %s32_s20 }
   0x4   :  { %p936_p2 = scmp.lt.s32.totalorder %s930_s24, %s930_s24 }
   0x6   :  { %p937_p3 = por %p936_p2, %p935_p1 }
   0x8   :  { %p938_p4 = pnand %p937_p3, %p931_p0 }
   0xa   :  { %941 = shalt.err (!%p938_p4)
}
   0xb   :  { %s984_s25 = smov [#allocation4]   ;;  %s942_s26 = scalar_lea.vmem %s22_s23, 16 }
   0xc   :  { %34 = dma.vmem_to_smem %s32_s20, 16, %s984_s25, [#allocation5]  }
   0xd   :  { %p943_p5 = scmp.ne.s32.totalorder %s22_s23, %s942_s26  ;;  %p947_p6 = scmp.lt.s32.totalorder %s22_s23, %s22_s23 }
   0xe   :  { %p948_p7 = scmp.lt.s32.totalorder %s942_s26, %s942_s26 }
  0x10   :  { %p949_p8 = por %p948_p7, %p947_p6 }
  0x12   :  { %p950_p9 = pnand %p949_p8, %p943_p5 }
  0x14   :  { %953 = shalt.err (!%p950_p9)
}
  0x15   :  { %s985_s2 = smov [#allocation2]   ;;  %s41_s28 = sshll.u32 %s1307_s3, 4  ;;  %s42_s28 = int_to_ptr.vmem [resolvable:$true] %s41_s28 }
  0x16   :  { %24 = dma.vmem_to_smem %s22_s23, 16, %s985_s2, [#allocation3]  }
  0x17   :  { %s51_s6 = sshll.u32 %s1308_s4, 4  ;;  %s954_s7 = scalar_lea.vmem %s42_s28, 16  ;;  %s52_s6 = int_to_ptr.vmem [resolvable:$true] %s51_s6 }
  0x18   :  { %p955_p10 = scmp.ne.s32.totalorder %s42_s28, %s954_s7  ;;  %p959_p11 = scmp.lt.s32.totalorder %s42_s28, %s42_s28 }
  0x19   :  { %p960_p12 = scmp.lt.s32.totalorder %s954_s7, %s954_s7 }
  0x1b   :  { %p961_p13 = por %p960_p12, %p959_p11 }
  0x1d   :  { %p962_p0 = pnand %p961_p13, %p955_p10 }
  0x1f   :  { %965 = shalt.err (!%p962_p0)
}
  0x20   :  { %s986_s8 = smov [#allocation6]   ;;  %s966_s9 = scalar_lea.vmem %s52_s6, 16 }
  0x21   :  { %44 = dma.vmem_to_smem %s42_s28, 16, %s986_s8, [#allocation5]  }
  0x22   :  { %p967_p1 = scmp.ne.s32.totalorder %s52_s6, %s966_s9  ;;  %p971_p2 = scmp.lt.s32.totalorder %s52_s6, %s52_s6 }
  0x23   :  { %p972_p3 = scmp.lt.s32.totalorder %s966_s9, %s966_s9 }
  0x25   :  { %p973_p4 = por %p972_p3, %p971_p2 }
  0x27   :  { %p974_p5 = pnand %p973_p4, %p967_p1 }
  0x29   :  { %977 = shalt.err (!%p974_p5)
}
  0x2a   :  { %s987_s3 = smov [#allocation7]  }
  0x2b   :  { %54 = dma.vmem_to_smem %s52_s6, 16, %s987_s3, [#allocation8]  }
  0x2c   :  { %978 = dma.done.wait [#allocation3], 16  }
  0x2d   :  { %979 = vsyncadd [#allocation3], 4294967280 }
  0x2e   :  { %980 = dma.done.wait [#allocation5], 32  }
  0x2f   :  { %981 = vsyncadd [#allocation5], 4294967264 }
  0x30   :  { %982 = dma.done.wait [#allocation8], 16  }
  0x31   :  { %983 = vsyncadd [#allocation8], 4294967280 }
  0x32   :  { %67 = sfence }
  0x33   :  { %s70_s4 = sld [smem:[#allocation2]]  ;;  %v1036_v0 = vld [vmem:[%s1304_s0] sm:$0xff]  ;;  %v1041_v1 = vld [vmem:[%s1304_s0 + $0x8] sm:$0xff]  ;;  %vm148_vm0 = vcmask 1041409   ;;  %vm153_vm1 = vcmask 1041408  }
  0x34   :  { %s822_s10 = sld [smem:[#allocation2 + $0x1]] }
  0x35   :  { %s825_s11 = sld [smem:[#allocation2 + $0x2]] }
  0x36   :  { %s828_s12 = sld [smem:[#allocation2 + $0x3]] }
  0x37   :  { %s1031_s13 = sld [smem:[#allocation4]] }
  0x38   :  { %s832_s18 = sld [smem:[#allocation2 + $0x4]] }
  0x39   :  { %v71_v2 = vstv %s70_s4  ;;  %s833_s19 = sld [smem:[#allocation2 + $0x5]] }
  0x3a   :  { %v72_v3 = vmul.f32 %v71_v2, %v1036_v0  ;;  %v75_v4 = vstv %s822_s10  ;;  %s1044_s20 = sld [smem:[#allocation2 + $0x6]]  ;;  %v73_v5 = vmul.f32 %v71_v2, %v1041_v1 }
  0x3b   :  { %v76_v6 = vmul.f32 %v75_v4, %v1036_v0  ;;  %v77_v7 = vmul.f32 %v75_v4, %v1041_v1  ;;  %v89_v8 = vstv %s825_s11  ;;  %s1049_s21 = sld [smem:[#allocation2 + $0x7]] }
  0x3c   :  { %v90_v9 = vmul.f32 %v89_v8, %v1036_v0  ;;  %v91_v10 = vmul.f32 %v89_v8, %v1041_v1  ;;  %v103_v11 = vstv %s828_s12  ;;  %s1060_s0 = sld [smem:[#allocation4 + $0x1]] }
  0x3d   :  { %v823_v12 = vrot.slane %v76_v6, 9  ;;  %v824_v13 = vrot.slane %v77_v7, 9  ;;  %v104_v14 = vmul.f32 %v103_v11, %v1036_v0  ;;  %v105_v15 = vmul.f32 %v103_v11, %v1041_v1  ;;  %s848_s22 = sld [smem:[#allocation2 + $0x9]] }
  0x3e   :  { %v826_v16 = vrot.slane %v90_v9, 10  ;;  %v827_v17 = vrot.slane %v91_v10, 10  ;;  %v261_v18 = vstv %s832_s18  ;;  %v117_v31 = vstv %s1031_s13  ;;  %s847_s23 = sld [smem:[#allocation2 + $0x8]] }
  0x3f   :  { %v86_v19 = vadd.f32 %v823_v12, %v72_v3  ;;  %v87_v20 = vadd.f32 %v824_v13, %v73_v5  ;;  %v829_v21 = vrot.slane %v104_v14, 11  ;;  %v830_v22 = vrot.slane %v105_v15, 11  ;;  %s851_s24 = sld [smem:[#allocation2 + $0xa]] }
  0x40   :  { %v262_v23 = vmul.f32 %v261_v18, %v1036_v0  ;;  %v263_v24 = vmul.f32 %v261_v18, %v1041_v1  ;;  %v265_v25 = vstv %s833_s19  ;;  %v279_v26 = vstv %s1044_s20  ;;  %s1068_s25 = sld [smem:[#allocation2 + $0xb]] }
  0x41   :  { %v100_v27 = vadd.f32 %v826_v16, %v86_v19  ;;  %v101_v28 = vadd.f32 %v827_v17, %v87_v20  ;;  %v266_v29 = vmul.f32 %v265_v25, %v1036_v0  ;;  %v267_v30 = vmul.f32 %v265_v25, %v1041_v1  ;;  %s1075_s26 = sld [smem:[#allocation4 + $0x2]] }
  0x42   :  { %v280_v32 = vmul.f32 %v279_v26, %v1036_v0  ;;  %v281_v33 = vmul.f32 %v279_v26, %v1041_v1  ;;  %v293_v34 = vstv %s1049_s21  ;;  %v307_v53 = vstv %s1060_s0  ;;  %s863_s2 = sld [smem:[#allocation2 + $0xd]] }
  0x43   :  { %v114_v35 = vadd.f32 %v829_v21, %v100_v27  ;;  %v115_v36 = vadd.f32 %v830_v22, %v101_v28  ;;  %v834_v37 = vrot.slane %v266_v29, 9  ;;  %v835_v38 = vrot.slane %v267_v30, 9  ;;  %s862_s1 = sld [smem:[#allocation2 + $0xc]] }
  0x44   :  { %v837_v39 = vrot.slane %v280_v32, 10  ;;  %v838_v40 = vrot.slane %v281_v33, 10  ;;  %v294_v41 = vmul.f32 %v293_v34, %v1036_v0  ;;  %v295_v42 = vmul.f32 %v293_v34, %v1041_v1  ;;  %s866_s27 = sld [smem:[#allocation2 + $0xe]] }
  0x45   :  { %v118_v43 = vadd.f32 %v117_v31, %v114_v35  ;;  %v119_v44 = vadd.f32 %v117_v31, %v115_v36  ;;  %v276_v45 = vadd.f32 %v834_v37, %v262_v23  ;;  %v277_v46 = vadd.f32 %v835_v38, %v263_v24  ;;  %s869_s28 = sld [smem:[#allocation2 + $0xf]] }
  0x46   :  { %v840_v47 = vrot.slane %v294_v41, 11  ;;  %v841_v48 = vrot.slane %v295_v42, 11  ;;  %v450_v54 = vstv %s848_s22  ;;  %v446_v58 = vstv %s847_s23  ;;  %s872_s29 = sld [smem:[#allocation4 + $0x3]] }
  0x47   :  { %v122_v49 = vmul.f32 0.70710677, %v118_v43  ;;  %v123_v50 = vmul.f32 0.70710677, %v119_v44  ;;  %v290_v51 = vadd.f32 %v837_v39, %v276_v45  ;;  %v291_v52 = vadd.f32 %v838_v40, %v277_v46  ;;  %s210_s10 = sld [smem:[#allocation6]] }
  0x48   :  { %v451_v57 = vmul.f32 %v450_v54, %v1036_v0  ;;  %v452_v59 = vmul.f32 %v450_v54, %v1041_v1  ;;  %v447_v62 = vmul.f32 %v446_v58, %v1036_v0  ;;  %v448_v63 = vmul.f32 %v446_v58, %v1041_v1  ;;  %s212_s11 = sld [smem:[#allocation7]] }
  0x49   :  { %906 = verf.f32 %v122_v49  ;;  %v304_v55 = vadd.f32 %v840_v47, %v290_v51  ;;  %v305_v56 = vadd.f32 %v841_v48, %v291_v52  ;;  %v464_v4 = vstv %s851_s24 }
  0x4a   :  { %908 = verf.f32 %v123_v50  ;;  %v849_v2 = vrot.slane %v451_v57, 9  ;;  %v850_v3 = vrot.slane %v452_v59, 9  ;;  %v132_v5 = vlaneseq }
  0x4b   :  { %v308_v60 = vadd.f32 %v307_v53, %v304_v55  ;;  %v309_v61 = vadd.f32 %v307_v53, %v305_v56  ;;  %v465_v10 = vmul.f32 %v464_v4, %v1036_v0  ;;  %v466_v11 = vmul.f32 %v464_v4, %v1041_v1 }
  0x4c   :  { %v461_v8 = vadd.f32 %v849_v2, %v447_v62  ;;  %v462_v9 = vadd.f32 %v850_v3, %v448_v63  ;;  %v478_v12 = vstv %s1068_s25  ;;  %v1083_v17 = vshrl.u32 %v132_v5, 7 }
  0x4d   :  { %v312_v6 = vmul.f32 0.70710677, %v308_v60  ;;  %v313_v7 = vmul.f32 0.70710677, %v309_v61  ;;  %v852_v13 = vrot.slane %v465_v10, 10  ;;  %v853_v14 = vrot.slane %v466_v11, 10 }
  0x4e   :  { %v479_v15 = vmul.f32 %v478_v12, %v1036_v0  ;;  %v480_v16 = vmul.f32 %v478_v12, %v1041_v1  ;;  %v492_v22 = vstv %s1075_s26  ;;  %v120_v23 = vmul.f32 0.5, %v118_v43  ;;  %s843_s26 = sld [smem:[#allocation6 + $0x1]] }
  0x4f   :  { %910 = verf.f32 %v312_v6  ;;  %v475_v18 = vadd.f32 %v852_v13, %v461_v8  ;;  %v476_v19 = vadd.f32 %v853_v14, %v462_v9  ;;  %v121_v26 = vmul.f32 0.5, %v119_v44 }
  0x50   :  { %912 = verf.f32 %v313_v7  ;;  %v855_v20 = vrot.slane %v479_v15, 11  ;;  %v856_v21 = vrot.slane %v480_v16, 11  ;;  %v1087_v30 = vsub.s32 0, %v1083_v17 }
  0x51   :  { %v1090_v31 = vsub.s32 4, %v1083_v17  ;;  %v310_v48 = vmul.f32 0.5, %v308_v60  ;;  %v311_v49 = vmul.f32 0.5, %v309_v61  ;;  %vm1229_vm2 = vcmp.lt.s32.totalorder %v132_v5, 256 }
  0x52   :  { %v489_v24 = vadd.f32 %v855_v20, %v475_v18  ;;  %v490_v27 = vadd.f32 %v856_v21, %v476_v19 }
  0x54   :  { %v493_v32 = vadd.f32 %v492_v22, %v489_v24  ;;  %v494_v34 = vadd.f32 %v492_v22, %v490_v27 }
  0x56   :  { %v907_v25 = vpop.eup %906  ;;  %v497_v36 = vmul.f32 0.70710677, %v493_v32  ;;  %v498_v38 = vmul.f32 0.70710677, %v494_v34  ;;  %v495_v22 = vmul.f32 0.5, %v493_v32  ;;  %v496_v24 = vmul.f32 0.5, %v494_v34 }
  0x57   :  { %v909_v28 = vpop.eup %908  ;;  %v126_v29 = vadd.f32 1.0, %v907_v25 }
  0x58   :  { %v127_v33 = vadd.f32 1.0, %v909_v28  ;;  %914 = verf.f32 %v497_v36 }
  0x59   :  { %v1092_v35 = vmul.f32 %v126_v29, %v120_v23  ;;  %916 = verf.f32 %v498_v38 }
  0x5a   :  { %v1094_v37 = vmul.f32 %v127_v33, %v121_v26 }
  0x5b   :  { %v135_v39 = vrot.slane %v1092_v35, %v1087_v30  ;;  %v139_v40 = vrot.slane %v1092_v35, %v1090_v31  ;;  %v167_v41 = vmul.f32 %v1092_v35, %v1092_v35 }
  0x5c   :  { %v143_v42 = vrot.slane %v1094_v37, %v1087_v30  ;;  %v147_v43 = vrot.slane %v1094_v37, %v1090_v31  ;;  %v168_v44 = vmul.f32 %v1094_v37, %v1094_v37  ;;  %v911_v45 = vpop.eup %910 }
  0x5d   :  { %v174_v46 = vrot.slane %v167_v41, %v1087_v30  ;;  %v178_v47 = vrot.slane %v167_v41, %v1090_v31  ;;  %v913_v50 = vpop.eup %912  ;;  %v316_v57 = vadd.f32 1.0, %v911_v45 }
  0x5e   :  { %v149_v51 = vsel %vm148_vm0, %v143_v42, %v135_v39  ;;  %v150_v52 = vsel %vm148_vm0, %v147_v43, %v139_v40  ;;  %v182_v53 = vrot.slane %v168_v44, %v1087_v30  ;;  %v186_v54 = vrot.slane %v168_v44, %v1090_v31 }
  0x5f   :  { %v154_v55 = vsel %vm153_vm1, %v149_v51, 0.0  ;;  %v155_v56 = vsel %vm153_vm1, %v150_v52, 0.0  ;;  %v317_v58 = vadd.f32 1.0, %v913_v50  ;;  %v1120_v2 = vmul.f32 %v316_v57, %v310_v48 }
  0x60   :  { %v156_v59 = vadd.f32 %v155_v56, %v154_v55  ;;  %v187_v62 = vsel %vm148_vm0, %v182_v53, %v174_v46  ;;  %v188_v60 = vsel %vm148_vm0, %v186_v54, %v178_v47 }
  0x61   :  { %v191_v61 = vsel %vm153_vm1, %v187_v62, 0.0  ;;  %v192_v63 = vsel %vm153_vm1, %v188_v60, 0.0  ;;  %v1122_v3 = vmul.f32 %v317_v58, %v311_v49  ;;  %v325_v6 = vrot.slane %v1120_v2, %v1087_v30 }
  0x62   :  { %157 = vadd.xlane.f32.xlu0 %v156_v59  ;;  %v193_v4 = vadd.f32 %v192_v63, %v191_v61  ;;  %v329_v7 = vrot.slane %v1120_v2, %v1090_v31  ;;  %v355_v10 = vmul.f32 %v1120_v2, %v1120_v2  ;;  %v635_v59 = vstv %s863_s2  ;;  %s844_s2 = sld [smem:[#allocation7 + $0x1]] }
  0x63   :  { %v333_v8 = vrot.slane %v1122_v3, %v1087_v30  ;;  %v337_v9 = vrot.slane %v1122_v3, %v1090_v31  ;;  %v356_v11 = vmul.f32 %v1122_v3, %v1122_v3  ;;  %v636_v62 = vmul.f32 %v635_v59, %v1036_v0 }
  0x64   :  { %v362_v16 = vrot.slane %v355_v10, %v1087_v30  ;;  %v366_v18 = vrot.slane %v355_v10, %v1090_v31  ;;  %v637_v60 = vmul.f32 %v635_v59, %v1041_v1  ;;  %v631_v61 = vstv %s862_s1 }
  0x65   :  { %v338_v12 = vsel %vm148_vm0, %v333_v8, %v325_v6  ;;  %v339_v13 = vsel %vm148_vm0, %v337_v9, %v329_v7  ;;  %v370_v20 = vrot.slane %v356_v11, %v1087_v30  ;;  %v374_v21 = vrot.slane %v356_v11, %v1090_v31  ;;  %v915_v23 = vpop.eup %914 }
  0x66   :  { %194 = vadd.xlane.f32.xlu0 %v193_v4  ;;  %v342_v14 = vsel %vm153_vm1, %v338_v12, 0.0  ;;  %v343_v15 = vsel %vm153_vm1, %v339_v13, 0.0  ;;  %v917_v25 = vpop.eup %916  ;;  %v501_v28 = vadd.f32 1.0, %v915_v23  ;;  %v632_v63 = vmul.f32 %v631_v61, %v1036_v0 }
  0x67   :  { %v344_v19 = vadd.f32 %v343_v15, %v342_v14  ;;  %v375_v26 = vsel %vm148_vm0, %v370_v20, %v362_v16  ;;  %v376_v27 = vsel %vm148_vm0, %v374_v21, %v366_v18  ;;  %v502_v36 = vadd.f32 1.0, %v917_v25 }
  0x68   :  { %v379_v29 = vsel %vm153_vm1, %v375_v26, 0.0  ;;  %v380_v33 = vsel %vm153_vm1, %v376_v27, 0.0  ;;  %v1148_v39 = vmul.f32 %v501_v28, %v495_v22  ;;  %v633_v4 = vmul.f32 %v631_v61, %v1041_v1 }
  0x69   :  { %345 = vadd.xlane.f32.xlu1 %v344_v19  ;;  %v381_v38 = vadd.f32 %v380_v33, %v379_v29  ;;  %v1150_v40 = vmul.f32 %v502_v36, %v496_v24  ;;  %v864_v6 = vrot.slane %v636_v62, 9  ;;  %v865_v7 = vrot.slane %v637_v60, 9 }
  0x6a   :  { %v510_v32 = vrot.slane %v1148_v39, %v1087_v30  ;;  %v514_v34 = vrot.slane %v1148_v39, %v1090_v31  ;;  %v540_v41 = vmul.f32 %v1148_v39, %v1148_v39  ;;  %v649_v8 = vstv %s866_s27 }
  0x6b   :  { %v518_v42 = vrot.slane %v1150_v40, %v1087_v30  ;;  %v522_v43 = vrot.slane %v1150_v40, %v1090_v31  ;;  %v541_v44 = vmul.f32 %v1150_v40, %v1150_v40  ;;  %v663_v9 = vstv %s869_s28 }
  0x6c   :  { %v547_v45 = vrot.slane %v540_v41, %v1087_v30  ;;  %v551_v46 = vrot.slane %v540_v41, %v1090_v31  ;;  %v646_v10 = vadd.f32 %v864_v6, %v632_v63  ;;  %v647_v11 = vadd.f32 %v865_v7, %v633_v4 }
  0x6d   :  { %382 = vadd.xlane.f32.xlu1 %v381_v38  ;;  %v523_v47 = vsel %vm148_vm0, %v518_v42, %v510_v32  ;;  %v524_v48 = vsel %vm148_vm0, %v522_v43, %v514_v34  ;;  %v555_v49 = vrot.slane %v541_v44, %v1087_v30  ;;  %v559_v50 = vrot.slane %v541_v44, %v1090_v31 }
  0x6e   :  { %v527_v51 = vsel %vm153_vm1, %v523_v47, 0.0  ;;  %v528_v52 = vsel %vm153_vm1, %v524_v48, 0.0  ;;  %v650_v12 = vmul.f32 %v649_v8, %v1036_v0  ;;  %v651_v13 = vmul.f32 %v649_v8, %v1041_v1 }
  0x6f   :  { %v529_v53 = vadd.f32 %v528_v52, %v527_v51  ;;  %v560_v54 = vsel %vm148_vm0, %v555_v49, %v547_v45  ;;  %v561_v55 = vsel %vm148_vm0, %v559_v50, %v551_v46  ;;  %v664_v14 = vmul.f32 %v663_v9, %v1036_v0 }
  0x70   :  { %v564_v56 = vsel %vm153_vm1, %v560_v54, 0.0  ;;  %v565_v57 = vsel %vm153_vm1, %v561_v55, 0.0  ;;  %v665_v15 = vmul.f32 %v663_v9, %v1041_v1  ;;  %v867_v16 = vrot.slane %v650_v12, 10 }
  0x71   :  { %530 = vadd.xlane.f32.xlu0 %v529_v53  ;;  %v566_v58 = vadd.f32 %v565_v57, %v564_v56  ;;  %v868_v18 = vrot.slane %v651_v13, 10  ;;  %v870_v19 = vrot.slane %v664_v14, 11  ;;  %v677_v23 = vstv %s872_s29 }
  0x72   :  { %v871_v20 = vrot.slane %v665_v15, 11  ;;  %v660_v21 = vadd.f32 %v867_v16, %v646_v10 }
  0x73   :  { %567 = vadd.xlane.f32.xlu1 %v566_v58  ;;  %v661_v22 = vadd.f32 %v868_v18, %v647_v11 }
  0x74   :  { %v674_v24 = vadd.f32 %v870_v19, %v660_v21 }
  0x75   :  { %v675_v25 = vadd.f32 %v871_v20, %v661_v22 }
  0x76   :  { %v678_v26 = vadd.f32 %v677_v23, %v674_v24 }
  0x77   :  { %v679_v27 = vadd.f32 %v677_v23, %v675_v25 }
  0x78   :  { %v682_v28 = vmul.f32 0.70710677, %v678_v26  ;;  %v680_v33 = vmul.f32 0.5, %v678_v26 }
  0x79   :  { %v683_v29 = vmul.f32 0.70710677, %v679_v27  ;;  %v681_v0 = vmul.f32 0.5, %v679_v27 }
  0x7a   :  { %918 = verf.f32 %v682_v28 }
  0x7b   :  { %920 = verf.f32 %v683_v29 }
  0x87   :  { %v919_v36 = vpop.eup %918 }
  0x88   :  { %v921_v38 = vpop.eup %920  ;;  %v686_v1 = vadd.f32 1.0, %v919_v36 }
  0x89   :  { %v687_v32 = vadd.f32 1.0, %v921_v38 }
  0x8a   :  { %v1184_v34 = vmul.f32 %v686_v1, %v680_v33 }
  0x8b   :  { %v1186_v41 = vmul.f32 %v687_v32, %v681_v0  ;;  %v988_v0 = vmov 1966171168  }
  0x8c   :  { %v695_v42 = vrot.slane %v1184_v34, %v1087_v30  ;;  %v699_v43 = vrot.slane %v1184_v34, %v1090_v31  ;;  %v725_v44 = vmul.f32 %v1184_v34, %v1184_v34  ;;  %v224_v38 = vunpack.c.l.s4 %v988_v0 }
  0x8d   :  { %v703_v45 = vrot.slane %v1186_v41, %v1087_v30  ;;  %v707_v46 = vrot.slane %v1186_v41, %v1090_v31  ;;  %v726_v47 = vmul.f32 %v1186_v41, %v1186_v41 }
  0x8e   :  { %v732_v48 = vrot.slane %v725_v44, %v1087_v30  ;;  %v736_v49 = vrot.slane %v725_v44, %v1090_v31  ;;  %v225_v1 = vunpack.c.0.s8 %v224_v38 }
  0x8f   :  { %v708_v50 = vsel %vm148_vm0, %v703_v45, %v695_v42  ;;  %v709_v51 = vsel %vm148_vm0, %v707_v46, %v699_v43  ;;  %v740_v52 = vrot.slane %v726_v47, %v1087_v30  ;;  %v744_v53 = vrot.slane %v726_v47, %v1090_v31 }
  0x90   :  { %v712_v54 = vsel %vm153_vm1, %v708_v50, 0.0  ;;  %v713_v55 = vsel %vm153_vm1, %v709_v51, 0.0  ;;  %v1224_v47 = vsub.s32 %v225_v1, %v1083_v17 }
  0x91   :  { %v714_v56 = vadd.f32 %v713_v55, %v712_v54  ;;  %v745_v57 = vsel %vm148_vm0, %v740_v52, %v732_v48  ;;  %v746_v58 = vsel %vm148_vm0, %v744_v53, %v736_v49 }
  0x92   :  { %v749_v59 = vsel %vm153_vm1, %v745_v57, 0.0  ;;  %v750_v62 = vsel %vm153_vm1, %v746_v58, 0.0 }
  0x93   :  { %715 = vadd.xlane.f32.xlu0 %v714_v56  ;;  %v751_v60 = vadd.f32 %v750_v62, %v749_v59 }
  0x95   :  { %752 = vadd.xlane.f32.xlu1 %v751_v60 }
  0xeb   :  { %v158_v61 = vpop.xlane.xlu0 %157 }
  0xec   :  { %v159_v30 = vrot.slane %v158_v61, 4 }
  0xee   :  { %v160_v63 = vadd.f32 %v159_v30, %v158_v61 }
  0xef   :  { %v195_v31 = vpop.xlane.xlu0 %194 }
  0xf0   :  { %v161_v4 = vrot.slane %v160_v63, 2  ;;  %v196_v6 = vrot.slane %v195_v31, 4 }
  0xf2   :  { %v197_v7 = vadd.f32 %v196_v6, %v195_v31  ;;  %v162_v8 = vadd.f32 %v161_v4, %v160_v63  ;;  %v346_v15 = vpop.xlane.xlu1 %345 }
  0xf3   :  { %v347_v18 = vrot.slane %v346_v15, 4 }
  0xf4   :  { %v198_v9 = vrot.slane %v197_v7, 2  ;;  %v163_v10 = vrot.slane %v162_v8, 1 }
  0xf5   :  { %v348_v20 = vadd.f32 %v347_v18, %v346_v15 }
  0xf6   :  { %v164_v11 = vadd.f32 %v163_v10, %v162_v8  ;;  %v199_v12 = vadd.f32 %v198_v9, %v197_v7  ;;  %v383_v16 = vpop.xlane.xlu1 %382 }
  0xf7   :  { %v384_v19 = vrot.slane %v383_v16, 4  ;;  %v349_v23 = vrot.slane %v348_v20, 2 }
  0xf8   :  { %877 = vpush %v164_v11  ;;  %v200_v13 = vrot.slane %v199_v12, 1 }
  0xf9   :  { %v385_v21 = vadd.f32 %v384_v19, %v383_v16  ;;  %v350_v25 = vadd.f32 %v349_v23, %v348_v20 }
  0xfa   :  { %v201_v14 = vadd.f32 %v200_v13, %v199_v12  ;;  %v531_v32 = vpop.xlane.xlu0 %530 }
  0xfb   :  { %v386_v24 = vrot.slane %v385_v21, 2  ;;  %v351_v27 = vrot.slane %v350_v25, 1  ;;  %v532_v44 = vrot.slane %v531_v32, 4 }
  0xfc   :  { %879 = vpush %v201_v14  ;;  %v568_v43 = vpop.xlane.xlu1 %567 }
  0xfd   :  { %v387_v26 = vadd.f32 %v386_v24, %v385_v21  ;;  %v352_v33 = vadd.f32 %v351_v27, %v350_v25  ;;  %v569_v48 = vrot.slane %v568_v43, 4  ;;  %v533_v52 = vadd.f32 %v532_v44, %v531_v32 }
  0xff   :  { %v388_v28 = vrot.slane %v387_v26, 1  ;;  %v570_v55 = vadd.f32 %v569_v48, %v568_v43  ;;  %v534_v57 = vrot.slane %v533_v52, 2 }
 0x101   :  { %v389_v36 = vadd.f32 %v388_v28, %v387_v26  ;;  %v571_v5 = vrot.slane %v570_v55, 2  ;;  %v535_v58 = vadd.f32 %v534_v57, %v533_v52 }
 0x103   :  { %v572_v59 = vadd.f32 %v571_v5, %v570_v55  ;;  %v536_v62 = vrot.slane %v535_v58, 1 }
 0x105   :  { %v573_v60 = vrot.slane %v572_v59, 1  ;;  %v537_v30 = vadd.f32 %v536_v62, %v535_v58 }
 0x107   :  { %v574_v63 = vadd.f32 %v573_v60, %v572_v59 }
 0x11c   :  { %v716_v31 = vpop.xlane.xlu0 %715 }
 0x11d   :  { %v717_v7 = vrot.slane %v716_v31, 4 }
 0x11e   :  { %v753_v6 = vpop.xlane.xlu1 %752 }
 0x11f   :  { %v754_v10 = vrot.slane %v753_v6, 4  ;;  %v718_v14 = vadd.f32 %v717_v7, %v716_v31 }
 0x121   :  { %v755_v18 = vadd.f32 %v754_v10, %v753_v6 }
 0x129   :  { %s878_s30 = spop %877 }
 0x12a   :  { %s1212_s6 = smul.f32 0.001953125, %s878_s30 }
 0x12c   :  { %s204_s7 = smul.f32 %s1212_s6, %s1212_s6 }
 0x12d   :  { %s880_s8 = spop %879 }
 0x12e   :  { %s203_s9 = smul.f32 0.001953125, %s880_s8 }
 0x130   :  { %s205_s3 = ssub.f32 %s203_s9, %s204_s7 }
 0x132   :  { %s206_s4 = sadd.f32 1e-05, %s205_s3 }
 0x134   :  { %v207_v22 = vstv %s206_s4 }
 0x135   :  { %922 = vrsqrt.f32 %v207_v22 }
 0x142   :  { %v923_v29 = vpop.eup %922 }
 0x143   :  { %881 = vpush %v923_v29 }
 0x144   :  { %883 = vpush %v352_v33 }
 0x145   :  { %885 = vpush %v389_v36 }
 0x174   :  { %s882_s12 = spop %881 }
 0x175   :  { %s211_s13 = smul.f32 %s882_s12, %s210_s10  ;;  %s884_s14 = spop %883 }
 0x176   :  { %s1216_s15 = smul.f32 0.001953125, %s884_s14  ;;  %s886_s16 = spop %885 }
 0x177   :  { %s213_s17 = smul.f32 %s211_s13, %s1212_s6  ;;  %v215_v42 = vstv %s211_s13  ;;  %s858_s14 = sld [smem:[#allocation6 + $0x2]] }
 0x178   :  { %s392_s18 = smul.f32 %s1216_s15, %s1216_s15  ;;  %v216_v45 = vmul.f32 %v215_v42, %v1092_v35  ;;  %v217_v46 = vmul.f32 %v215_v42, %v1094_v37 }
 0x179   :  { %s214_s19 = ssub.f32 %s212_s11, %s213_s17  ;;  %s391_s20 = smul.f32 0.001953125, %s886_s16 }
 0x17b   :  { %v218_v49 = vstv %s214_s19  ;;  %s393_s21 = ssub.f32 %s391_s20, %s392_s18 }
 0x17c   :  { %v219_v50 = vadd.f32 %v218_v49, %v216_v45  ;;  %v220_v51 = vadd.f32 %v218_v49, %v217_v46 }
 0x17d   :  { %s394_s0 = sadd.f32 1e-05, %s393_s21 }
 0x17e   :  { %v229_v53 = vrot.slane %v219_v50, %v1224_v47  ;;  %v243_v54 = vrot.slane %v220_v51, %v1224_v47 }
 0x17f   :  { %v395_v37 = vstv %s394_s0 }
 0x180   :  { %v236_v17 = vrot.slane %v229_v53, %v1224_v47  ;;  %v250_v56 = vrot.slane %v243_v54, %v1224_v47  ;;  %924 = vrsqrt.f32 %v395_v37 }
 0x182   :  { %257 = vst.msk [vmem:[%s1309_s5] ss:$4 sm:$0x3] %vm1229_vm2, %v236_v17  ;;  %831 = vst.msk [vmem:[%s1309_s5 + $0x8] ss:$4 sm:$0x3] %vm1229_vm2, %v250_v56 }
 0x18d   :  { %v925_v61 = vpop.eup %924 }
 0x18e   :  { %887 = vpush %v925_v61 }
 0x18f   :  { %889 = vpush %v537_v30 }
 0x190   :  { %891 = vpush %v574_v63 }
 0x1bf   :  { %s888_s1 = spop %887 }
 0x1c0   :  { %s399_s27 = smul.f32 %s888_s1, %s843_s26  ;;  %s890_s28 = spop %889 }
 0x1c1   :  { %s1245_s29 = smul.f32 0.001953125, %s890_s28  ;;  %s892_s30 = spop %891 }
 0x1c2   :  { %s401_s6 = smul.f32 %s399_s27, %s1216_s15  ;;  %v403_v4 = vstv %s399_s27  ;;  %s859_s15 = sld [smem:[#allocation7 + $0x2]] }
 0x1c3   :  { %s577_s7 = smul.f32 %s1245_s29, %s1245_s29  ;;  %v404_v8 = vmul.f32 %v403_v4, %v1120_v2  ;;  %v405_v9 = vmul.f32 %v403_v4, %v1122_v3  ;;  %v719_v2 = vrot.slane %v718_v14, 2  ;;  %v756_v3 = vrot.slane %v755_v18, 2  ;;  %s873_s28 = sld [smem:[#allocation6 + $0x3]] }
 0x1c4   :  { %s402_s8 = ssub.f32 %s844_s2, %s401_s6  ;;  %s576_s9 = smul.f32 0.001953125, %s892_s30 }
 0x1c5   :  { %v720_v22 = vadd.f32 %v719_v2, %v718_v14  ;;  %v757_v23 = vadd.f32 %v756_v3, %v755_v18 }
 0x1c6   :  { %v406_v11 = vstv %s402_s8  ;;  %s578_s3 = ssub.f32 %s576_s9, %s577_s7 }
 0x1c7   :  { %v407_v12 = vadd.f32 %v406_v11, %v404_v8  ;;  %v408_v13 = vadd.f32 %v406_v11, %v405_v9  ;;  %v721_v24 = vrot.slane %v720_v22, 1  ;;  %v758_v25 = vrot.slane %v757_v23, 1 }
 0x1c8   :  { %s579_s4 = sadd.f32 1e-05, %s578_s3 }
 0x1c9   :  { %v417_v15 = vrot.slane %v407_v12, %v1224_v47  ;;  %v431_v16 = vrot.slane %v408_v13, %v1224_v47  ;;  %v722_v27 = vadd.f32 %v721_v24, %v720_v22  ;;  %v759_v28 = vadd.f32 %v758_v25, %v757_v23 }
 0x1ca   :  { %v580_v19 = vstv %s579_s4 }
 0x1cb   :  { %v424_v20 = vrot.slane %v417_v15, %v1224_v47  ;;  %v438_v21 = vrot.slane %v431_v16, %v1224_v47  ;;  %926 = vrsqrt.f32 %v580_v19 }
 0x1cd   :  { %845 = vst.msk [vmem:[%s1309_s5 + $0x1] ss:$4 sm:$0x3] %vm1229_vm2, %v424_v20  ;;  %846 = vst.msk [vmem:[%s1309_s5 + $0x9] ss:$4 sm:$0x3] %vm1229_vm2, %v438_v21 }
 0x1d8   :  { %v927_v26 = vpop.eup %926 }
 0x1d9   :  { %893 = vpush %v927_v26 }
 0x1da   :  { %895 = vpush %v722_v27 }
 0x1db   :  { %897 = vpush %v759_v28 }
 0x20a   :  { %s894_s16 = spop %893 }
 0x20b   :  { %s584_s17 = smul.f32 %s894_s16, %s858_s14  ;;  %s896_s18 = spop %895 }
 0x20c   :  { %s1266_s19 = smul.f32 0.001953125, %s896_s18  ;;  %s898_s20 = spop %897 }
 0x20d   :  { %s586_s21 = smul.f32 %s584_s17, %s1245_s29  ;;  %v588_v29 = vstv %s584_s17  ;;  %s874_s29 = sld [smem:[#allocation7 + $0x3]] }
 0x20e   :  { %s762_s0 = smul.f32 %s1266_s19, %s1266_s19  ;;  %v589_v33 = vmul.f32 %v588_v29, %v1148_v39  ;;  %v590_v36 = vmul.f32 %v588_v29, %v1150_v40 }
 0x20f   :  { %s587_s22 = ssub.f32 %s859_s15, %s586_s21  ;;  %s761_s23 = smul.f32 0.001953125, %s898_s20 }
 0x211   :  { %v591_v0 = vstv %s587_s22  ;;  %s763_s24 = ssub.f32 %s761_s23, %s762_s0 }
 0x212   :  { %v592_v38 = vadd.f32 %v591_v0, %v589_v33  ;;  %v593_v1 = vadd.f32 %v591_v0, %v590_v36 }
 0x213   :  { %s764_s25 = sadd.f32 1e-05, %s763_s24 }
 0x214   :  { %v602_v32 = vrot.slane %v592_v38, %v1224_v47  ;;  %v616_v42 = vrot.slane %v593_v1, %v1224_v47 }
 0x215   :  { %v765_v43 = vstv %s764_s25 }
 0x216   :  { %v609_v44 = vrot.slane %v602_v32, %v1224_v47  ;;  %v623_v45 = vrot.slane %v616_v42, %v1224_v47  ;;  %928 = vrsqrt.f32 %v765_v43 }
 0x218   :  { %860 = vst.msk [vmem:[%s1309_s5 + $0x2] ss:$4 sm:$0x3] %vm1229_vm2, %v609_v44  ;;  %861 = vst.msk [vmem:[%s1309_s5 + $0xa] ss:$4 sm:$0x3] %vm1229_vm2, %v623_v45 }
 0x223   :  { %v929_v39 = vpop.eup %928 }
 0x224   :  { %899 = vpush %v929_v39 }
 0x255   :  { %s900_s30 = spop %899 }
 0x256   :  { %s769_s6 = smul.f32 %s900_s30, %s873_s28 }
 0x258   :  { %s771_s7 = smul.f32 %s769_s6, %s1266_s19  ;;  %v773_v40 = vstv %s769_s6 }
 0x259   :  { %v774_v46 = vmul.f32 %v773_v40, %v1184_v34  ;;  %v775_v48 = vmul.f32 %v773_v40, %v1186_v41 }
 0x25a   :  { %s772_s8 = ssub.f32 %s874_s29, %s771_s7 }
 0x25c   :  { %v776_v49 = vstv %s772_s8 }
 0x25d   :  { %v777_v50 = vadd.f32 %v776_v49, %v774_v46  ;;  %v778_v51 = vadd.f32 %v776_v49, %v775_v48 }
 0x25f   :  { %v787_v52 = vrot.slane %v777_v50, %v1224_v47  ;;  %v801_v53 = vrot.slane %v778_v51, %v1224_v47 }
 0x261   :  { %v794_v54 = vrot.slane %v787_v52, %v1224_v47  ;;  %v808_v55 = vrot.slane %v801_v53, %v1224_v47 }
 0x263   :  { %875 = vst.msk [vmem:[%s1309_s5 + $0x3] ss:$4 sm:$0x3] %vm1229_vm2, %v794_v54  ;;  %876 = vst.msk [vmem:[%s1309_s5 + $0xb] ss:$4 sm:$0x3] %vm1229_vm2, %v808_v55 }
 0x264   :  { %819 = vsyncpa [#allocation3], 1 }
 0x265   :  { %820 = vsyncpa [#allocation5], 1 }
 0x266   :  { %821 = vsyncpa [#allocation8], 1 }

</bundles_post_ra>
